<compile_context>
chip_gen: v7x
topology: tpu7x:2x2x1
jax: 0.10.0
libtpu: 0.0.40
codegen_flags: <defaults>
</compile_context>

<pallas_src>
import jax
import jax.numpy as jnp
from jax.experimental import pallas as pl
from jax.experimental.pallas import tpu as pltpu


def memory_read_kernel(mem_ref, inp_ref, slab_ref, w1_ref, w2_ref, out_ref, xbuf_ref):
    """mem_ref:  [bt, M, D] f32   memory tokens
       inp_ref:  [bt, S, D] f32   input tokens
       slab_ref: [N+4, D]   f32   rows 0..M-1 mem-pos, M..N-1 inp-pos,
                                  N: ln_gamma, N+1: ln_beta, N+2: b1, N+3: b2 (zero-padded)
       w1_ref:   [D, D]     bf16
       w2_ref:   [D, R]     bf16
       out_ref:  [bt, R, D]
       xbuf_ref: [bt, N, D] f32   VMEM scratch (in-VMEM concat buffer)
    """
    eps = 1e-5
    bt, M, D = mem_ref.shape
    S = inp_ref.shape[1]
    N = M + S
    R = w2_ref.shape[1]

    ln_g = slab_ref[N:N + 1, :]        # [1, D]
    ln_b = slab_ref[N + 1:N + 2, :]    # [1, D]
    b1 = slab_ref[N + 2:N + 3, :]      # [1, D]
    b2 = slab_ref[N + 3:N + 4, :R]     # [1, R]

    # Add positional embeddings; stitch the two token streams in VMEM (no HBM concat).
    xbuf_ref[:, :M, :] = mem_ref[...] + slab_ref[:M, :][None]
    xbuf_ref[:, M:, :] = inp_ref[...] + slab_ref[M:N, :][None]
    x = xbuf_ref[...].reshape(bt * N, D)           # clean merge: N multiple of 8 (f32)

    # LayerNorm over embedding dim (f32 elementwise).
    mu = jnp.mean(x, axis=-1, keepdims=True)
    var = jnp.mean((x - mu) ** 2, axis=-1, keepdims=True)
    x_ln = (x - mu) * jax.lax.rsqrt(var + eps) * ln_g + ln_b
    # dropout: eval-mode identity

    # MLP summarizer: bf16 MXU operands, f32 accumulation, f32 elementwise.
    x_bf = x_ln.astype(jnp.bfloat16)
    h = jnp.dot(x_bf, w1_ref[...], preferred_element_type=jnp.float32) + b1
    h = jax.nn.gelu(h)
    logits = jnp.dot(h.astype(jnp.bfloat16), w2_ref[...],
                     preferred_element_type=jnp.float32) + b2          # [bt*N, R]

    # Put the (longer) token axis on lanes for the softmax and the final matmul.
    logits_t = jnp.transpose(logits.reshape(bt, N, R), (0, 2, 1))      # [bt, R, N]
    m = jnp.max(logits_t, axis=-1, keepdims=True)
    e = jnp.exp(logits_t - m)
    p = e * pl.reciprocal(jnp.sum(e, axis=-1, keepdims=True), approx=True)  # [bt, R, N]

    # Weighted token sum (tiny matmul): keep both operands in f32 for precision.
    out = jnp.einsum("bkn,bnd->bkd", p, x_ln.reshape(bt, N, D),
                     preferred_element_type=jnp.float32)               # [bt, R, D]
    out_ref[...] = out.astype(out_ref.dtype)


def memory_read_forward(memory, input_tokens, params, *, batch_tile=None):
    """memory: [B, M, D], input_tokens: [B, S, D] -> read tokens [B, R, D]."""
    B, M, D = memory.shape
    _, S, _ = input_tokens.shape
    N = M + S
    R = params["w2"].shape[1]

    # Batch tile: target ~1024 MXU rows (bt*N) per grid step, but keep >= 2 grid
    # steps whenever B >= 2 so the "parallel" axis shards across v7x's two TCs.
    if batch_tile is None:
        bt = max(1, min(B, 1024 // N))
        bt = min(bt, max(1, B // 2))
    else:
        bt = batch_tile
    n_tiles = pl.cdiv(B, bt)   # ragged last tile: OOB reads are garbage, write masked

    # Pack all small per-row parameters into ONE [N+4, D] slab -> 5 DMA streams total.
    pos = jnp.concatenate(
        [jnp.broadcast_to(params["mem_pos"], (M, D)),
         jnp.broadcast_to(params["inp_pos"], (S, D))], axis=0)          # [N, D]
    b2_pad = jnp.zeros((D,), jnp.float32).at[:R].set(params["b2"])
    vec = jnp.stack([params["ln_g"], params["ln_b"], params["b1"], b2_pad], axis=0)
    slab = jnp.concatenate([pos, vec], axis=0).astype(jnp.float32)      # [N+4, D]

    # bf16 weights: MXU-native, halves weight DMA bytes.
    w1 = params["w1"].astype(jnp.bfloat16)                              # [D, D]
    w2 = params["w2"].astype(jnp.bfloat16)                              # [D, R]

    grid_spec = pltpu.PrefetchScalarGridSpec(
        num_scalar_prefetch=0,
        grid=(n_tiles,),
        in_specs=[
            pl.BlockSpec((bt, M, D), lambda i: (i, 0, 0)),   # memory tokens
            pl.BlockSpec((bt, S, D), lambda i: (i, 0, 0)),   # input tokens
            pl.BlockSpec((N + 4, D), lambda i: (0, 0)),      # packed param slab
            pl.BlockSpec((D, D), lambda i: (0, 0)),          # w1
            pl.BlockSpec((D, R), lambda i: (0, 0)),          # w2
        ],
        out_specs=pl.BlockSpec((bt, R, D), lambda i: (i, 0, 0)),
        scratch_shapes=[pltpu.VMEM((bt, N, D), jnp.float32)],
    )

    cost = pl.CostEstimate(
        flops=2 * B * N * D * (D + R) + 2 * B * R * N * D,
        transcendentals=B * N * (D + R),
        bytes_accessed=4 * B * (N + R) * D + 2 * D * (D + R) + 4 * (N + 4) * D,
    )

    fn = pl.pallas_call(
        memory_read_kernel,
        out_shape=jax.ShapeDtypeStruct((B, R, D), memory.dtype),
        grid_spec=grid_spec,
        cost_estimate=cost,
        compiler_params=pltpu.CompilerParams(
            dimension_semantics=("parallel",),
            # Safe on v7x (64 MiB physical); actual use is << this on all generations.
            vmem_limit_bytes=48 * 1024 * 1024,
        ),
    )
    return fn(memory, input_tokens, slab, w1, w2)


def reference_forward(memory, input_tokens, p):
    """Pure-JAX f32 reference with identical math (for verification)."""
    eps = 1e-5
    mem_p = memory + p["mem_pos"][None]
    inp_p = input_tokens + p["inp_pos"][None]
    x = jnp.concatenate([mem_p, inp_p], axis=1)
    mu = jnp.mean(x, axis=-1, keepdims=True)
    var = jnp.mean((x - mu) ** 2, axis=-1, keepdims=True)
    x = (x - mu) * jax.lax.rsqrt(var + eps) * p["ln_g"] + p["ln_b"]
    h = jax.nn.gelu(jnp.einsum("bnd,de->bne", x, p["w1"]) + p["b1"])
    logits = jnp.einsum("bne,ek->bnk", h, p["w2"]) + p["b2"]
    w = jax.nn.softmax(logits, axis=1)
    return jnp.einsum("bnk,bnd->bkd", w, x)


if __name__ == "__main__":
    # Config consistent with MemoryReadOperation(embedding_dim=128, r=16)
    B, D = 2, 128
    MEMORY_SIZE, INPUT_SIZE, R = 32, 16, 16

    key = jax.random.PRNGKey(0)
    ks = jax.random.split(key, 8)
    f32 = jnp.float32

    params = {
        # positional embeddings (torch.randn(1,1,D)/sqrt(D)) stored as [1, D]
        "mem_pos": jax.random.normal(ks[0], (1, D), f32) / (D ** 0.5),
        "inp_pos": jax.random.normal(ks[1], (1, D), f32) / (D ** 0.5),
        # LayerNorm (gamma=1, beta=0 as in nn.LayerNorm init)
        "ln_g": jnp.ones((D,), f32),
        "ln_b": jnp.zeros((D,), f32),
        # MLP summarizer: D -> D -> r
        "w1": jax.random.normal(ks[2], (D, D), f32) * 0.02,
        "b1": jnp.zeros((D,), f32),
        "w2": jax.random.normal(ks[3], (D, R), f32) * 0.02,
        "b2": jnp.zeros((R,), f32),
    }

    memory = jax.random.normal(ks[4], (B, MEMORY_SIZE, D), f32)
    input_tokens = jax.random.normal(ks[5], (B, INPUT_SIZE, D), f32)

    read_tokens = memory_read_forward(memory, input_tokens, params)
    read_tokens = jax.block_until_ready(read_tokens)

    ref = reference_forward(memory, input_tokens, params)
    assert read_tokens.shape == (B, R, D)
    # tolerance covers bf16 MXU operands (f32 accumulation) + approx reciprocal
    assert jnp.allclose(read_tokens, ref, atol=5e-3, rtol=5e-3)

    print("KERNEL_OK")
</pallas_src>

<mosaic_0001>
module attributes {stable_mosaic.version = 11 : i64} {
  func.func @memory_read_kernel(%arg0: i32, %arg1: memref<1x32x128xf32, #tpu.memory_space<vmem>>, %arg2: memref<1x16x128xf32, #tpu.memory_space<vmem>>, %arg3: memref<52x128xf32, #tpu.memory_space<vmem>>, %arg4: memref<128x128xbf16, #tpu.memory_space<vmem>>, %arg5: memref<128x16xbf16, #tpu.memory_space<vmem>>, %arg6: memref<1x16x128xf32, #tpu.memory_space<vmem>>, %arg7: memref<1x48x128xf32, #tpu.memory_space<vmem>>) attributes {dimension_semantics = [#tpu.dimension_semantics<parallel>], iteration_bounds = array<i64: 2>, scalar_prefetch = 0 : i64, scratch_operands = 1 : i64, tpu.core_type = #tpu.core_type<tc>, window_params = [{transform_indices = @transform_0, window_bounds = array<i64: 1, 32, 128>}, {transform_indices = @transform_1, window_bounds = array<i64: 1, 16, 128>}, {pipeline_mode = #tpu.pipeline_mode<synchronous>, transform_indices = @transform_2, window_bounds = array<i64: 52, 128>}, {pipeline_mode = #tpu.pipeline_mode<synchronous>, transform_indices = @transform_3, window_bounds = array<i64: 128, 128>}, {pipeline_mode = #tpu.pipeline_mode<synchronous>, transform_indices = @transform_4, window_bounds = array<i64: 128, 16>}, {transform_indices = @transform_5, window_bounds = array<i64: 1, 16, 128>}]} {
    %c48 = arith.constant 48 : index
    %c0 = arith.constant 0 : index
    %0 = vector.load %arg3[%c48, %c0] : memref<52x128xf32, #tpu.memory_space<vmem>>, vector<1x128xf32>
    %c49 = arith.constant 49 : index
    %c0_0 = arith.constant 0 : index
    %1 = vector.load %arg3[%c49, %c0_0] : memref<52x128xf32, #tpu.memory_space<vmem>>, vector<1x128xf32>
    %c50 = arith.constant 50 : index
    %c0_1 = arith.constant 0 : index
    %2 = vector.load %arg3[%c50, %c0_1] : memref<52x128xf32, #tpu.memory_space<vmem>>, vector<1x128xf32>
    %c51 = arith.constant 51 : index
    %c0_2 = arith.constant 0 : index
    %3 = vector.load %arg3[%c51, %c0_2] : memref<52x128xf32, #tpu.memory_space<vmem>>, vector<1x16xf32>
    %c0_3 = arith.constant 0 : index
    %c0_4 = arith.constant 0 : index
    %c0_5 = arith.constant 0 : index
    %4 = vector.load %arg1[%c0_3, %c0_4, %c0_5] : memref<1x32x128xf32, #tpu.memory_space<vmem>>, vector<1x32x128xf32>
    %c0_6 = arith.constant 0 : index
    %c0_7 = arith.constant 0 : index
    %5 = vector.load %arg3[%c0_6, %c0_7] : memref<52x128xf32, #tpu.memory_space<vmem>>, vector<32x128xf32>
    %6 = vector.shape_cast %5 : vector<32x128xf32> to vector<1x32x128xf32>
    %7 = arith.addf %4, %6 : vector<1x32x128xf32>
    %c0_8 = arith.constant 0 : index
    %c0_9 = arith.constant 0 : index
    %c0_10 = arith.constant 0 : index
    %8 = vector.load %arg7[%c0_8, %c0_9, %c0_10] : memref<1x48x128xf32, #tpu.memory_space<vmem>>, vector<1x32x128xf32>
    tpu.vector_store %arg7[%c0_8, %c0_9, %c0_10], %7 {strides = array<i32>} : memref<1x48x128xf32, #tpu.memory_space<vmem>>, vector<1x32x128xf32>,
    %c0_11 = arith.constant 0 : index
    %c0_12 = arith.constant 0 : index
    %c0_13 = arith.constant 0 : index
    %9 = vector.load %arg2[%c0_11, %c0_12, %c0_13] : memref<1x16x128xf32, #tpu.memory_space<vmem>>, vector<1x16x128xf32>
    %c32 = arith.constant 32 : index
    %c0_14 = arith.constant 0 : index
    %10 = vector.load %arg3[%c32, %c0_14] : memref<52x128xf32, #tpu.memory_space<vmem>>, vector<16x128xf32>
    %11 = vector.shape_cast %10 : vector<16x128xf32> to vector<1x16x128xf32>
    %12 = arith.addf %9, %11 : vector<1x16x128xf32>
    %c0_15 = arith.constant 0 : index
    %c32_16 = arith.constant 32 : index
    %c0_17 = arith.constant 0 : index
    %13 = vector.load %arg7[%c0_15, %c32_16, %c0_17] : memref<1x48x128xf32, #tpu.memory_space<vmem>>, vector<1x16x128xf32>
    tpu.vector_store %arg7[%c0_15, %c32_16, %c0_17], %12 {strides = array<i32>} : memref<1x48x128xf32, #tpu.memory_space<vmem>>, vector<1x16x128xf32>,
    %c0_18 = arith.constant 0 : index
    %c0_19 = arith.constant 0 : index
    %c0_20 = arith.constant 0 : index
    %14 = vector.load %arg7[%c0_18, %c0_19, %c0_20] : memref<1x48x128xf32, #tpu.memory_space<vmem>>, vector<1x48x128xf32>
    %15 = vector.shape_cast %14 : vector<1x48x128xf32> to vector<48x128xf32>
    %cst = arith.constant dense<0.000000e+00> : vector<48xf32>
    %16 = vector.multi_reduction <add>, %15, %cst [1] : vector<48x128xf32> to vector<48xf32>
    %17 = vector.shape_cast %16 : vector<48xf32> to vector<48x1xf32>
    %cst_21 = arith.constant 1.280000e+02 : f32
    %18 = vector.broadcast %cst_21 : f32 to vector<48x1xf32>
    %19 = arith.divf %17, %18 : vector<48x1xf32>
    %20 = vector.broadcast %19 : vector<48x1xf32> to vector<48x128xf32>
    %21 = arith.subf %15, %20 : vector<48x128xf32>
    %22 = arith.mulf %21, %21 : vector<48x128xf32>
    %cst_22 = arith.constant dense<0.000000e+00> : vector<48xf32>
    %23 = vector.multi_reduction <add>, %22, %cst_22 [1] : vector<48x128xf32> to vector<48xf32>
    %24 = vector.shape_cast %23 : vector<48xf32> to vector<48x1xf32>
    %cst_23 = arith.constant 1.280000e+02 : f32
    %25 = vector.broadcast %cst_23 : f32 to vector<48x1xf32>
    %26 = arith.divf %24, %25 : vector<48x1xf32>
    %27 = vector.broadcast %19 : vector<48x1xf32> to vector<48x128xf32>
    %28 = arith.subf %15, %27 : vector<48x128xf32>
    %cst_24 = arith.constant 9.99999974E-6 : f32
    %29 = vector.broadcast %cst_24 : f32 to vector<48x1xf32>
    %30 = arith.addf %26, %29 : vector<48x1xf32>
    %31 = math.rsqrt %30 : vector<48x1xf32>
    %32 = vector.broadcast %31 : vector<48x1xf32> to vector<48x128xf32>
    %33 = arith.mulf %28, %32 : vector<48x128xf32>
    %34 = vector.broadcast %0 : vector<1x128xf32> to vector<48x128xf32>
    %35 = arith.mulf %33, %34 : vector<48x128xf32>
    %36 = vector.broadcast %1 : vector<1x128xf32> to vector<48x128xf32>
    %37 = arith.addf %35, %36 : vector<48x128xf32>
    %38 = arith.truncf %37 : vector<48x128xf32> to vector<48x128xbf16>
    %c0_25 = arith.constant 0 : index
    %c0_26 = arith.constant 0 : index
    %39 = vector.load %arg4[%c0_25, %c0_26] : memref<128x128xbf16, #tpu.memory_space<vmem>>, vector<128x128xbf16>
    %cst_27 = arith.constant dense<0.000000e+00> : vector<48x128xf32>
    %40 = tpu.matmul %38, %39, %cst_27 {dimension_numbers = #tpu.dot_dimension_numbers<[1], [0], [0], [1], [0, 0, 1, 1], [], []>} : vector<48x128xbf16>, vector<128x128xbf16>, vector<48x128xf32> -> vector<48x128xf32>
    %41 = vector.broadcast %2 : vector<1x128xf32> to vector<48x128xf32>
    %42 = arith.addf %40, %41 : vector<48x128xf32>
    %43 = arith.mulf %42, %42 : vector<48x128xf32>
    %44 = arith.mulf %42, %43 : vector<48x128xf32>
    %cst_28 = arith.constant 4.471500e-02 : f32
    %45 = vector.broadcast %cst_28 : f32 to vector<48x128xf32>
    %46 = arith.mulf %45, %44 : vector<48x128xf32>
    %47 = arith.addf %42, %46 : vector<48x128xf32>
    %cst_29 = arith.constant 0.797884583 : f32
    %48 = vector.broadcast %cst_29 : f32 to vector<48x128xf32>
    %49 = arith.mulf %48, %47 : vector<48x128xf32>
    %50 = math.tanh %49 : vector<48x128xf32>
    %cst_30 = arith.constant 1.000000e+00 : f32
    %51 = vector.broadcast %cst_30 : f32 to vector<48x128xf32>
    %52 = arith.addf %51, %50 : vector<48x128xf32>
    %cst_31 = arith.constant 5.000000e-01 : f32
    %53 = vector.broadcast %cst_31 : f32 to vector<48x128xf32>
    %54 = arith.mulf %53, %52 : vector<48x128xf32>
    %55 = arith.mulf %42, %54 : vector<48x128xf32>
    %56 = arith.truncf %55 : vector<48x128xf32> to vector<48x128xbf16>
    %c0_32 = arith.constant 0 : index
    %c0_33 = arith.constant 0 : index
    %57 = vector.load %arg5[%c0_32, %c0_33] : memref<128x16xbf16, #tpu.memory_space<vmem>>, vector<128x16xbf16>
    %cst_34 = arith.constant dense<0.000000e+00> : vector<48x16xf32>
    %58 = tpu.matmul %56, %57, %cst_34 {dimension_numbers = #tpu.dot_dimension_numbers<[1], [0], [0], [1], [0, 0, 1, 1], [], []>} : vector<48x128xbf16>, vector<128x16xbf16>, vector<48x16xf32> -> vector<48x16xf32>
    %59 = vector.broadcast %3 : vector<1x16xf32> to vector<48x16xf32>
    %60 = arith.addf %58, %59 : vector<48x16xf32>
    %61 = vector.shape_cast %60 : vector<48x16xf32> to vector<1x48x16xf32>
    %62 = tpu.transpose %61, [0, 2, 1] : vector<1x48x16xf32> -> vector<1x16x48xf32>
    %cst_35 = arith.constant dense<0xFF800000> : vector<1x16xf32>
    %63 = vector.multi_reduction <maximumf>, %62, %cst_35 [2] : vector<1x16x48xf32> to vector<1x16xf32>
    %64 = vector.shape_cast %63 : vector<1x16xf32> to vector<1x16x1xf32>
    %65 = vector.broadcast %64 : vector<1x16x1xf32> to vector<1x16x48xf32>
    %66 = arith.subf %62, %65 : vector<1x16x48xf32>
    %67 = math.exp %66 : vector<1x16x48xf32>
    %cst_36 = arith.constant dense<0.000000e+00> : vector<1x16xf32>
    %68 = vector.multi_reduction <add>, %67, %cst_36 [2] : vector<1x16x48xf32> to vector<1x16xf32>
    %69 = vector.shape_cast %68 : vector<1x16xf32> to vector<1x16x1xf32>
    %70 = tpu.reciprocal %69 {approx = true} : vector<1x16x1xf32> -> vector<1x16x1xf32>
    %71 = vector.broadcast %70 : vector<1x16x1xf32> to vector<1x16x48xf32>
    %72 = arith.mulf %67, %71 : vector<1x16x48xf32>
    %73 = vector.shape_cast %37 : vector<48x128xf32> to vector<1x48x128xf32>
    "tpu.trace_start"() <{level = 10 : i32, message = "bkn,bnd->bkd"}> : () -> ()
    %cst_37 = arith.constant dense<0.000000e+00> : vector<1x16x128xf32>
    %74 = tpu.matmul %72, %73, %cst_37 {dimension_numbers = #tpu.dot_dimension_numbers<[2], [1], [1], [2], [0, 0, 0, 1, 1, 2], [0], [0]>} : vector<1x16x48xf32>, vector<1x48x128xf32>, vector<1x16x128xf32> -> vector<1x16x128xf32>
    "tpu.trace_stop"() : () -> ()
    %c0_38 = arith.constant 0 : index
    %c0_39 = arith.constant 0 : index
    %c0_40 = arith.constant 0 : index
    %75 = vector.load %arg6[%c0_38, %c0_39, %c0_40] : memref<1x16x128xf32, #tpu.memory_space<vmem>>, vector<1x16x128xf32>
    tpu.vector_store %arg6[%c0_38, %c0_39, %c0_40], %74 {strides = array<i32>} : memref<1x16x128xf32, #tpu.memory_space<vmem>>, vector<1x16x128xf32>,
    return
  }
  func.func @transform_0(%arg0: i32) -> (i32, i32, i32) {
    %c0_i32 = arith.constant 0 : i32
    %c0_i32_0 = arith.constant 0 : i32
    %c0_i32_1 = arith.constant 0 : i32
    return %arg0, %c0_i32, %c0_i32_0 : i32, i32, i32
  }
  func.func @transform_1(%arg0: i32) -> (i32, i32, i32) {
    %c0_i32 = arith.constant 0 : i32
    %c0_i32_0 = arith.constant 0 : i32
    %c0_i32_1 = arith.constant 0 : i32
    return %arg0, %c0_i32, %c0_i32_0 : i32, i32, i32
  }
  func.func @transform_2(%arg0: i32) -> (i32, i32) {
    %c0_i32 = arith.constant 0 : i32
    %c0_i32_0 = arith.constant 0 : i32
    %c0_i32_1 = arith.constant 0 : i32
    return %c0_i32, %c0_i32_0 : i32, i32
  }
  func.func @transform_3(%arg0: i32) -> (i32, i32) {
    %c0_i32 = arith.constant 0 : i32
    %c0_i32_0 = arith.constant 0 : i32
    %c0_i32_1 = arith.constant 0 : i32
    return %c0_i32, %c0_i32_0 : i32, i32
  }
  func.func @transform_4(%arg0: i32) -> (i32, i32) {
    %c0_i32 = arith.constant 0 : i32
    %c0_i32_0 = arith.constant 0 : i32
    %c0_i32_1 = arith.constant 0 : i32
    return %c0_i32, %c0_i32_0 : i32, i32
  }
  func.func @transform_5(%arg0: i32) -> (i32, i32, i32) {
    %c0_i32 = arith.constant 0 : i32
    %c0_i32_0 = arith.constant 0 : i32
    %c0_i32_1 = arith.constant 0 : i32
    return %arg0, %c0_i32, %c0_i32_0 : i32, i32, i32
  }
}

</mosaic_0001>

<bundles_post_ra>
// kernel: tpu_custom_call.1
= control target key start
LH: loop header
LB: loop body
LE: loop exit
PB: predicated region body
PF: predicated region fallthrough
CT: control target
= control target key end

     0   :  { %10 = vsyncpa [#allocation4], 0  ;;  %s1798_s0 = inlined_call_operand.vmem [shape: f32[2,32,128], index: 0, kind: input, shape index: {}]   ;;  %s1799_s1 = inlined_call_operand.hbm [shape: f32[2,16,128], index: 1, kind: input, shape index: {}]   ;;  %s1800_s2 = inlined_call_operand.hbm [shape: f32[52,128], index: 2, kind: input, shape index: {}]   ;;  %s1801_s3 = inlined_call_operand.hbm [shape: bf16[128,128], index: 3, kind: input, shape index: {}]   ;;  %s1802_s4 = inlined_call_operand.vmem [shape: bf16[128,16], index: 4, kind: input, shape index: {}]   ;;  %s1803_s5 = inlined_call_operand.hbm [shape: f32[2,16,128], index: 5, kind: output, shape index: {}]  }
   0x1   :  { %12 = vsyncpa [#allocation4 + $0x1], 0 }
   0x2   :  { %13 = vsyncpa [#allocation7], 0 }
   0x3   :  { %14 = vsyncpa [#allocation5], 0 }
   0x4   :  { %16 = vsyncpa [#allocation5 + $0x1], 0  ;;  %s1461_s18 = smov 0   ;;  %s1463_s19 = smov 0  }
   0x5   :  { %s1465_s20 = smov 0   ;;  %s1467_s21 = smov 0  }
   0x6 LB: > { %s1482_s22 = sadd.s32 4294967295, %s1417_s21   ;;  %s980_s23 = sadd.s32 4294967294, %s1417_s21   ;;  %s1417_s21 = sphi %s1467_s21, %s1823_s21   ;;  %s1413_s20 = sphi %s1465_s20, %s1822_s20   ;;  %s1409_s19 = sphi %s1463_s19, %s1821_s19   ;;  %s1405_s18 = sphi %s1461_s18, %s1820_s18  }
   0x7   : > { %p68_p0 = scmp.ne.s32.totalorder %s1409_s19, %s1405_s18  ;;  %p1804_p1 = scmp.eq.s32.totalorder %s1482_s22, 0 }
   0x8   : > { %p161_p3 = scmp.eq.s32.totalorder %s980_s23, 1  ;;  %p981_p5 = scmp.ge.s32.totalorder %s1417_s21, 1 }
   0x9   : > { %p1491_p4 = por %p1804_p1, %p68_p0  ;;  %p168_p7 = scmp.lt.s32.totalorder %s1417_s21, 3 }
   0xa   : > { %p1496_p6 = por %p161_p3, %p68_p0  ;;  %s1419_s27 = smov [#allocation6]  }
   0xb   : > { %s1807_s24 = scalar_select %p1491_p4, 1, 0 }
   0xc   : > { %s1808_s25 = scalar_select %p1496_p6, 1, 0 }
   0xd   : > { %p1501_p8 = pnand %p981_p5, %p168_p7  ;;  %s180_s28 = sshll.u32 %s1419_s27, 4  ;;  %s1505_s28 = int_to_ptr.vmem [resolvable:$true] %s180_s28 }
   0xe   : > { %s1420_s30 = smov [#allocation8]   ;;  %s1261_s9 = scalar_lea.hbm %s1800_s2, 896 }
   0xf   : > { %p1150_p9 = pneg %p1501_p8  ;;  %s193_s6 = sshll.u32 %s1420_s30, 4  ;;  %s1516_s6 = int_to_ptr.vmem [resolvable:$true] %s193_s6 }
  0x10   : > { %p1262_p12 = scmp.ne.s32.totalorder %s1800_s2, %s1261_s9  ;;  %p1268_p5 = scmp.lt.u32.totalorder %s1261_s9, %s1800_s2 }
  0x11   : > { %p1512_p11 = pnand %p1150_p9, %p1804_p1 }
  0x13   : > { %p1263_p13 = pneg %p1512_p11 }
  0x15   : > { %p1264_p0 = pnand %p1263_p13, %p1262_p12 }
  0x17   : > { %p1265_p3 = pneg %p1264_p0 }
  0x19   : > { %p1270_p7 = pnand %p1268_p5, %p1265_p3 }
  0x1b   : > { %1273 = shalt.err (!%p1270_p7)
}
  0x1c   : > { %s1274_s14 = scalar_lea.vmem %s1505_s28, 896  ;;  %p1282_p2 = scmp.lt.s32.totalorder %s1505_s28, %s1505_s28 }
  0x1d   : > { %p1275_p9 = scmp.ne.s32.totalorder %s1505_s28, %s1274_s14  ;;  %p1283_p12 = scmp.lt.s32.totalorder %s1274_s14, %s1274_s14 }
  0x1f   : > { %p1277_p10 = pnand %p1275_p9, %p1263_p13  ;;  %p1284_p0 = por %p1283_p12, %p1282_p2 }
  0x21   : > { %p1278_p1 = pneg %p1277_p10 }
  0x23   : > { %p1285_p6 = pnand %p1284_p0, %p1278_p1 }
  0x25   : > { %1288 = shalt.err (!%p1285_p6)
}
  0x26   : > { %s1421_s15 = smov 128   ;;  %s1422_s16 = smov 8  }
  0x27   : > { %1153 = dma.hbm_to_vmem [thread:$0]  (!%p1512_p11), %s1800_s2, 896, %s1505_s28, [#allocation7], %s1421_s15, %s1421_s15, %s1422_s16  }
  0x28   : > { %s1289_s7 = scalar_lea.hbm %s1801_s3, 1024 }
  0x29   : > { %p1290_p1 = scmp.ne.s32.totalorder %s1801_s3, %s1289_s7  ;;  %p1296_p10 = scmp.lt.u32.totalorder %s1289_s7, %s1801_s3 }
  0x2b   : > { %p1292_p2 = pnand %p1290_p1, %p1263_p13 }
  0x2d   : > { %p1293_p6 = pneg %p1292_p2 }
  0x2f   : > { %p1298_p3 = pnand %p1296_p10, %p1293_p6 }
  0x31   : > { %1301 = shalt.err (!%p1298_p3)
}
  0x32   : > { %s1302_s28 = scalar_lea.vmem %s1516_s6, 1024  ;;  %p1310_p12 = scmp.lt.s32.totalorder %s1516_s6, %s1516_s6 }
  0x33   : > { %p1303_p5 = scmp.ne.s32.totalorder %s1516_s6, %s1302_s28  ;;  %p1311_p0 = scmp.lt.s32.totalorder %s1302_s28, %s1302_s28 }
  0x35   : > { %p1305_p7 = pnand %p1303_p5, %p1263_p13  ;;  %p1312_p1 = por %p1311_p0, %p1310_p12 }
  0x37   : > { %p1306_p9 = pneg %p1305_p7 }
  0x39   : > { %p1313_p2 = pnand %p1312_p1, %p1306_p9 }
  0x3b   : > { %1316 = shalt.err (!%p1313_p2)
}
  0x3c   : > { %s1423_s12 = smov 64   ;;  %s1424_s13 = smov 4  }
  0x3d   : > { %1156 = dma.hbm_to_vmem [thread:$0]  (!%p1512_p11), %s1801_s3, 1024, %s1516_s6, [#allocation7], %s1423_s12, %s1423_s12, %s1424_s13  }
  0x3e   : > { %s1574_s23 = sadd.s32 1, %s1417_s21   ;;  %s55_s30 = sadd.s32 1, %s1413_s20 }
  0x3f   : > { %s52_s27 = ssub.s32 %s1417_s21, %s1574_s23  ;;  %p62_p6 = scmp.ne.s32.totalorder %s1413_s20, %s1409_s19 }
  0x40   : > { %p53_p13 = scmp.eq.s32.totalorder %s52_s27, 0  ;;  %p63_p10 = scmp.eq.s32.totalorder %s1417_s21, 0 }
  0x41   : > { %p1811_p5 = scmp.eq.s32.totalorder %s1482_s22, 1  ;;  %p1167_p9 = scmp.lt.s32.totalorder %s1417_s21, 2 }
  0x42   : > { %s1583_s7 = scalar_select %p53_p13, %s1413_s20, %s55_s30  }
  0x43   : > { %p64_p3 = por %p63_p10, %p62_p6  ;;  %p1587_p7 = por %p1811_p5, %p62_p6 }
  0x44   : > { %s218_s29 = sand.u32 1, %s1413_s20   ;;  %s1022_s6 = sshll.u32 %s1417_s21, 8 }
  0x45   : > { %s1812_s8 = scalar_select %p1587_p7, 1, 0 }
  0x46   : > { %s985_s9 = sshll.u32 %s218_s29, 4  ;;  %s1597_s28 = scalar_lea.hbm %s1799_s1, %s1022_s6 }
  0x47   : > { %s222_s12 = scalar_lea.vmem [#allocation3], %s985_s9  ;;  %p1601_p11 = pnand %p1167_p9, %p64_p3 }
  0x48   : > { %s229_s13 = sshll.u32 %s222_s12, 4  ;;  %s1605_s17 = scalar_lea.sflag [#allocation4], %s218_s29  ;;  %s1599_s13 = int_to_ptr.vmem [resolvable:$true] %s229_s13 }
  0x49   : > { %s1317_s27 = scalar_lea.hbm %s1597_s28, 256  ;;  %p1319_p0 = pneg %p1601_p11 }
  0x4a   : > { %p1318_p12 = scmp.ne.s32.totalorder %s1597_s28, %s1317_s27  ;;  %s1322_s6 = scalar_lea.hbm %s1799_s1, 512 }
  0x4b   : > { %p1323_p13 = scmp.lt.u32.totalorder %s1597_s28, %s1799_s1  ;;  %p1324_p6 = scmp.lt.u32.totalorder %s1322_s6, %s1317_s27 }
  0x4c   : > { %p1320_p1 = pnand %p1319_p0, %p1318_p12  ;;  %p1326_p3 = scmp.lt.u32.totalorder %s1317_s27, %s1597_s28 }
  0x4d   : > { %p1325_p10 = por %p1324_p6, %p1323_p13 }
  0x4e   : > { %p1321_p2 = pneg %p1320_p1 }
  0x4f   : > { %p1327_p5 = por %p1326_p3, %p1325_p10 }
  0x51   : > { %p1328_p9 = pnand %p1327_p5, %p1321_p2 }
  0x53   : > { %1331 = shalt.err (!%p1328_p9)
}
  0x54   : > { %s1332_s29 = scalar_lea.vmem %s1599_s13, 256  ;;  %s1425_s12 = smov [#allocation3]  }
  0x55   : > { %p1333_p12 = scmp.ne.s32.totalorder %s1599_s13, %s1332_s29  ;;  %s1337_s30 = sshll.u32 %s1425_s12, 4  ;;  %s1338_s30 = int_to_ptr.vmem [resolvable:$false] %s1337_s30 }
  0x56   : > { %s1339_s9 = scalar_lea.vmem %s1338_s30, 512  ;;  %p1340_p4 = scmp.lt.s32.totalorder %s1599_s13, %s1338_s30 }
  0x57   : > { %p1335_p1 = pnand %p1333_p12, %p1319_p0  ;;  %p1341_p13 = scmp.lt.s32.totalorder %s1339_s9, %s1332_s29 }
  0x59   : > { %p1336_p7 = pneg %p1335_p1  ;;  %p1342_p6 = por %p1341_p13, %p1340_p4 }
  0x5b   : > { %p1343_p10 = pnand %p1342_p6, %p1336_p7 }
  0x5d   : > { %1346 = shalt.err (!%p1343_p10)
}
  0x5e   : > { %1160 = dma.hbm_to_vmem [thread:$0]  (!%p1601_p11), %s1597_s28, 256, %s1599_s13, %s1605_s17, %s1421_s15, %s1421_s15, %s1422_s16  }
  0x5f   : > { %241 = sbr.rel (%p1501_p8) target bundleno = 1566 (0x61e), region = 40  ;;  %s1639_s27 = sand.u32 (!%p1501_p8), 1, %s1409_s19  }
  0x60   : > { %s989_s6 = sshll.u32 (!%p1501_p8), %s1639_s27, 4  ;;  %s244_s10 = scalar_lea.sflag (!%p1501_p8), [#allocation4], %s1639_s27 }
  0x61   : > { %s247_s14 = scalar_lea.vmem (!%p1501_p8), [#allocation3], %s989_s6  ;;  %p1814_p4 = scmp.ne.s32.totalorder (!%p1501_p8), %s1807_s24, 0 }
  0x66   : > { %1392 = dma.done.wait (%p1814_p4), %s244_s10, 256  }
  0x67   : > { %1394 = vsyncadd (%p1814_p4), %s244_s10, 4294967040  ;;  %p1815_p7 = scmp.eq.s32.totalorder %s1482_s22, 0 }
  0x69   : > { %1396 = dma.done.wait (%p1815_p7), [#allocation7], 1920   ;;  %p1816_p8 = pmov %p1815_p7 }
  0x6a   : > { %p287_p11 = scmp.lt.s32.totalorder %s1482_s22, 1  ;;  %v301_v1 = vld [vmem:[#allocation6] sm:$0xff]  ;;  %v303_v4 = vld [vmem:[#allocation6 + $0x10] sm:$0xff]  ;;  %v302_v6 = vld [vmem:[#allocation6 + $0x8] sm:$0xff]  ;;  %v1426_v19 = vmov 0.0   ;;  %vm1427_vm0 = vmmov 0  }
  0x6b   : > { %1398 = vsyncadd (%p1816_p8), [#allocation7], 4294965376  ;;  %v304_v9 = vld [vmem:[#allocation6 + $0x18] sm:$0xff]  ;;  %v313_v10 = vld [vmem:[%s247_s14] sm:$0xff]  ;;  %1055 = vmatprep.subr.bf16.mxu0 %v1426_v19  ;;  %1083 = vmatprep.subr.bf16.mxu1 %v1426_v19  ;;  %vm756_vm1 = vcmask 392192   ;;  %s286_s11 = scalar_lea.vmem [#allocation9], %s989_s6 }
  0x6c   : > { %s288_s26 = scalar_select %p287_p11, %s1482_s22, 1  ;;  %v315_v12 = vld [vmem:[#allocation6 + $0x20] sm:$0xff]  ;;  %v314_v13 = vld [vmem:[%s247_s14 + $0x8] sm:$0xff]  ;;  %v1216_v46 = vld [vmem:[#allocation8 + $0x18] sm:$0xff]   ;;  %1071 = vmatprep.mubr.msk.bf16.mxu0 %vm1427_vm0, %v1426_v19  ;;  %1099 = vmatprep.mubr.msk.bf16.mxu1 %vm1427_vm0, %v1426_v19 }
  0x6d   : > { %v316_v14 = vld [vmem:[#allocation6 + $0x28] sm:$0xff]  ;;  %v317_v16 = vadd.f32 %v315_v12, %v313_v10  ;;  %v1213_v18 = vld [vmem:[#allocation8] sm:$0xff]   ;;  %v1214_v44 = vld [vmem:[#allocation8 + $0x8] sm:$0xff]   ;;  %s876_s29 = sshll.u32 %s286_s11, 4  ;;  %s1024_s12 = sshll.u32 %s1482_s22, 8  ;;  %s1749_s29 = int_to_ptr.vmem [resolvable:$true] %s876_s29 }
  0x6e   : > { %s1023_s15 = sshll.u32 %s288_s26, 5  ;;  %v318_v17 = vadd.f32 %v316_v14, %v314_v13  ;;  %1056 = vmatpush3.bf16.msra.mxu0 %v1213_v18  ;;  %v1215_v45 = vld [vmem:[#allocation8 + $0x10] sm:$0xff]   ;;  %v1217_v47 = vld [vmem:[#allocation8 + $0x20] sm:$0xff]   ;;  %v1218_v48 = vld [vmem:[#allocation8 + $0x28] sm:$0xff]   ;;  %s1754_s10 = scalar_lea.hbm %s1803_s5, %s1024_s12 }
  0x6f   : > { %s291_s13 = scalar_lea.vmem %s1798_s0, %s1023_s15  ;;  %1057 = vmatprep.subr.bf16.mxu0 %v1426_v19  ;;  %v1219_v49 = vld [vmem:[#allocation8 + $0x30] sm:$0xff]   ;;  %v1220_v50 = vld [vmem:[#allocation8 + $0x38] sm:$0xff]   ;;  %s863_s14 = scalar_lea.sflag [#allocation5], %s1639_s27 }
  0x70   : > { %v297_v0 = vld [vmem:[%s291_s13] sm:$0xff]  ;;  %v299_v2 = vld [vmem:[%s291_s13 + $0x10] sm:$0xff]  ;;  %v298_v5 = vld [vmem:[%s291_s13 + $0x8] sm:$0xff]  ;;  %s1347_s26 = scalar_lea.vmem %s1749_s29, 256  ;;  %p1817_p2 = scmp.ne.s32.totalorder %s1812_s8, 0 }
  0x71   : > { %v305_v3 = vadd.f32 %v301_v1, %v297_v0  ;;  %v307_v7 = vadd.f32 %v303_v4, %v299_v2  ;;  %v300_v8 = vld [vmem:[%s291_s13 + $0x18] sm:$0xff]  ;;  %v306_v11 = vadd.f32 %v302_v6, %v298_v5  ;;  %v996_v12 = vld [vmem:[#allocation6 + $0x31] ss:$0 sm:$0xff]  ;;  %p1348_p0 = scmp.ne.s32.totalorder %s1749_s29, %s1347_s26  ;;  %s1428_s22 = smov [#allocation9]  }
  0x72   : > { %v308_v15 = vadd.f32 %v304_v9, %v300_v8  ;;  %1058 = vmatpush3.bf16.msra.mxu0 %v1214_v44  ;;  %s1351_s6 = sshll.u32 %s1428_s22, 4  ;;  %s1352_s6 = int_to_ptr.vmem [resolvable:$false] %s1351_s6 }
  0x73   : > { %327 = vadd.xlane.f32.xlu0 %v305_v3  ;;  %331 = vadd.xlane.f32.xlu1 %v307_v7  ;;  %p1349_p3 = pnand %p1348_p0, %p1817_p2  ;;  %s1353_s15 = scalar_lea.vmem %s1352_s6, 512 }
  0x74   : > { %1059 = vmatprep.subr.bf16.mxu0 %v1426_v19  ;;  %p1354_p9 = scmp.lt.s32.totalorder %s1749_s29, %s1352_s6  ;;  %p1355_p12 = scmp.lt.s32.totalorder %s1353_s15, %s1347_s26 }
  0x75   : > { %p1350_p5 = pneg %p1349_p3 }
  0x76   : > { %1060 = vmatpush3.bf16.msra.mxu0 %v1215_v45  ;;  %p1356_p1 = por %p1355_p12, %p1354_p9 }
  0x77   : > { %329 = vadd.xlane.f32.xlu0 %v306_v11  ;;  %333 = vadd.xlane.f32.xlu1 %v308_v15 }
  0x78   : > { %1061 = vmatprep.subr.bf16.mxu0 %v1426_v19  ;;  %p1357_p13 = pnand %p1356_p1, %p1350_p5 }
  0x7a   : > { %1062 = vmatpush3.bf16.msra.mxu0 %v1216_v46 }
  0x7b   : > { %335 = vadd.xlane.f32.xlu0 %v317_v16  ;;  %337 = vadd.xlane.f32.xlu1 %v318_v17 }
  0x7c   : > { %1063 = vmatprep.subr.bf16.mxu0 %v1426_v19 }
  0x7e   : > { %1064 = vmatpush3.bf16.msra.mxu0 %v1217_v47 }
  0x7f   : > { %1065 = vmatprep.subr.bf16.mxu0 %v1426_v19 }
  0x82   : > { %1066 = vmatpush3.bf16.msra.mxu0 %v1218_v48 }
  0x83   : > { %1067 = vmatprep.subr.bf16.mxu0 %v1426_v19 }
  0x86   : > { %1068 = vmatpush3.bf16.msra.mxu0 %v1219_v49 }
  0x87   : > { %1069 = vmatprep.subr.bf16.mxu0 %v1426_v19 }
  0x8a   : > { %1070 = vmatpush3.bf16.msra.mxu0 %v1220_v50 }
 0x100   : > { %v328_v20 = vpop.xlane.xlu0 %327  ;;  %v332_v22 = vpop.xlane.xlu1 %331 }
 0x101   : > { %v340_v21 = vmul.f32 0.0078125, %v328_v20  ;;  %v342_v23 = vmul.f32 0.0078125, %v332_v22 }
 0x103   : > { %v1661_v24 = vsub.f32 %v305_v3, %v340_v21  ;;  %v1663_v25 = vsub.f32 %v307_v7, %v342_v23  ;;  %v995_v7 = vld [vmem:[#allocation6 + $0x30] ss:$0 sm:$0xff] }
 0x104   : > { %v330_v26 = vpop.xlane.xlu0 %329  ;;  %v334_v29 = vpop.xlane.xlu1 %333 }
 0x105   : > { %v341_v27 = vmul.f32 0.0078125, %v330_v26  ;;  %v352_v28 = vmul.f32 %v1661_v24, %v1661_v24  ;;  %v343_v30 = vmul.f32 0.0078125, %v334_v29  ;;  %v354_v32 = vmul.f32 %v1663_v25, %v1663_v25 }
 0x107   : > { %v1667_v31 = vsub.f32 %v306_v11, %v341_v27  ;;  %358 = vadd.xlane.f32.xlu0 %v352_v28  ;;  %v1671_v33 = vsub.f32 %v308_v15, %v343_v30 }
 0x108   : > { %v336_v34 = vpop.xlane.xlu0 %335  ;;  %v338_v37 = vpop.xlane.xlu1 %337 }
 0x109   : > { %v344_v35 = vmul.f32 0.0078125, %v336_v34  ;;  %v353_v36 = vmul.f32 %v1667_v31, %v1667_v31  ;;  %v345_v38 = vmul.f32 0.0078125, %v338_v37  ;;  %v355_v40 = vmul.f32 %v1671_v33, %v1671_v33  ;;  %v1223_v37 = vld [vmem:[%s1802_s4 + $0x10] sm:$0xff]  }
 0x10b   : > { %v1675_v39 = vsub.f32 %v317_v16, %v344_v35  ;;  %362 = vadd.xlane.f32.xlu0 %v354_v32  ;;  %360 = vadd.xlane.f32.xlu1 %v353_v36  ;;  %v1679_v41 = vsub.f32 %v318_v17, %v345_v38  ;;  %v1221_v35 = vld [vmem:[%s1802_s4] sm:$0xff]   ;;  %v1222_v36 = vld [vmem:[%s1802_s4 + $0x8] sm:$0xff]   ;;  %v1224_v38 = vld [vmem:[%s1802_s4 + $0x18] sm:$0xff]  }
 0x10c   : > { %1084 = vmatpush3.bf16.msra.mxu1 %v1221_v35 }
 0x10d   : > { %v356_v42 = vmul.f32 %v1675_v39, %v1675_v39  ;;  %v357_v43 = vmul.f32 %v1679_v41, %v1679_v41  ;;  %1085 = vmatprep.subr.bf16.mxu1 %v1426_v19 }
 0x10f   : > { %364 = vadd.xlane.f32.xlu1 %v355_v40  ;;  %366 = vadd.xlane.f32.xlu0 %v356_v42  ;;  %v1226_v40 = vld [vmem:[%s1802_s4 + $0x28] sm:$0xff]   ;;  %v1228_v42 = vld [vmem:[%s1802_s4 + $0x38] sm:$0xff]  }
 0x110   : > { %1086 = vmatpush3.bf16.msra.mxu1 %v1222_v36 }
 0x111   : > { %1087 = vmatprep.subr.bf16.mxu1 %v1426_v19 }
 0x113   : > { %368 = vadd.xlane.f32.xlu1 %v357_v43  ;;  %v997_v43 = vld [vmem:[#allocation6 + $0x32] ss:$0 sm:$0xff] }
 0x114   : > { %1088 = vmatpush3.bf16.msra.mxu1 %v1223_v37 }
 0x115   : > { %1089 = vmatprep.subr.bf16.mxu1 %v1426_v19 }
 0x118   : > { %1090 = vmatpush3.bf16.msra.mxu1 %v1224_v38 }
 0x119   : > { %1091 = vmatprep.subr.bf16.mxu1 %v1426_v19 }
 0x194   : > { %v359_v51 = vpop.xlane.xlu0 %358 }
 0x195   : > { %v370_v52 = vmul.f32 0.0078125, %v359_v51 }
 0x197   : > { %v376_v53 = vadd.f32 1e-05, %v370_v52 }
 0x198   : > { %v361_v54 = vpop.xlane.xlu1 %360  ;;  %v363_v55 = vpop.xlane.xlu0 %362 }
 0x199   : > { %1229 = vrsqrt.f32 %v376_v53  ;;  %v371_v56 = vmul.f32 0.0078125, %v361_v54  ;;  %v372_v57 = vmul.f32 0.0078125, %v363_v55 }
 0x19b   : > { %v377_v58 = vadd.f32 1e-05, %v371_v56  ;;  %v378_v59 = vadd.f32 1e-05, %v372_v57 }
 0x19c   : > { %v365_v60 = vpop.xlane.xlu1 %364  ;;  %v367_v61 = vpop.xlane.xlu0 %366 }
 0x19d   : > { %1231 = vrsqrt.f32 %v377_v58  ;;  %v373_v62 = vmul.f32 0.0078125, %v365_v60  ;;  %v374_v63 = vmul.f32 0.0078125, %v367_v61 }
 0x19e   : > { %1233 = vrsqrt.f32 %v378_v59 }
 0x19f   : > { %v379_v0 = vadd.f32 1e-05, %v373_v62  ;;  %v380_v1 = vadd.f32 1e-05, %v374_v63 }
 0x1a0   : > { %v369_v2 = vpop.xlane.xlu1 %368 }
 0x1a1   : > { %1235 = vrsqrt.f32 %v379_v0  ;;  %v375_v3 = vmul.f32 0.0078125, %v369_v2 }
 0x1a2   : > { %1237 = vrsqrt.f32 %v380_v1 }
 0x1a3   : > { %v1230_v4 = vpop.eup %1229  ;;  %v381_v5 = vadd.f32 1e-05, %v375_v3 }
 0x1a4   : > { %v388_v6 = vmul.f32 %v1230_v4, %v1661_v24 }
 0x1a5   : > { %1239 = vrsqrt.f32 %v381_v5 }
 0x1a6   : > { %v398_v11 = vmul.f32 %v995_v7, %v388_v6 }
 0x1a7   : > { %v1232_v8 = vpop.eup %1231 }
 0x1a8   : > { %v1234_v9 = vpop.eup %1233  ;;  %v389_v10 = vmul.f32 %v1232_v8, %v1667_v31  ;;  %v408_v18 = vadd.f32 %v996_v12, %v398_v11 }
 0x1a9   : > { %v390_v13 = vmul.f32 %v1234_v9, %v1663_v25 }
 0x1aa   : > { %v399_v14 = vmul.f32 %v995_v7, %v389_v10 }
 0x1ab   : > { %v1236_v15 = vpop.eup %1235  ;;  %v400_v16 = vmul.f32 %v995_v7, %v390_v13 }
 0x1ac   : > { %v1238_v17 = vpop.eup %1237  ;;  %v409_v20 = vadd.f32 %v996_v12, %v399_v14  ;;  %v391_v21 = vmul.f32 %v1236_v15, %v1671_v33 }
 0x1ad   : > { %v392_v22 = vmul.f32 %v1238_v17, %v1675_v39  ;;  %v410_v27 = vadd.f32 %v996_v12, %v400_v16  ;;  %v1225_v39 = vld [vmem:[%s1802_s4 + $0x20] sm:$0xff]  }
 0x1ae   : > { %v414_v23 = vpack.c.bf16 %v409_v20, %v408_v18  ;;  %v401_v24 = vmul.f32 %v995_v7, %v391_v21  ;;  %1092 = vmatpush3.bf16.msra.mxu1 %v1225_v39 }
 0x1af   : > { %v1240_v26 = vpop.eup %1239  ;;  %v402_v25 = vmul.f32 %v995_v7, %v392_v22  ;;  %1093 = vmatprep.subr.bf16.mxu1 %v1426_v19 }
 0x1b0   : > { %1072 = vmatmul.mubr.bf16.vlgmr.msra.gmra.mrb[0].mxu0 %v414_v23  ;;  %1127 = vmatprep.subr.bf16.mxu0 %v414_v23  ;;  %v411_v28 = vadd.f32 %v996_v12, %v401_v24  ;;  %v393_v29 = vmul.f32 %v1240_v26, %v1679_v41  ;;  %v1227_v41 = vld [vmem:[%s1802_s4 + $0x30] sm:$0xff]  }
 0x1b1   : > { %1129 = vmatpush3.bf16.msra.mxu0 %v414_v23  ;;  %1075 = vmatprep.mubr.msk.bf16.mxu0 %vm1427_vm0, %v1426_v19  ;;  %v412_v32 = vadd.f32 %v996_v12, %v402_v25 }
 0x1b2   : > { %v415_v30 = vpack.c.bf16 %v411_v28, %v410_v27  ;;  %v403_v31 = vmul.f32 %v995_v7, %v393_v29  ;;  %1094 = vmatpush3.bf16.msra.mxu1 %v1226_v40 }
 0x1b3   : > { %1095 = vmatprep.subr.bf16.mxu1 %v1426_v19 }
 0x1b4   : > { %1131 = vmatprep.subr.bf16.mxu0 %v415_v30  ;;  %v413_v33 = vadd.f32 %v996_v12, %v403_v31 }
 0x1b5   : > { %1133 = vmatpush3.bf16.msra.mxu0 %v415_v30 }
 0x1b6   : > { %v416_v34 = vpack.c.bf16 %v413_v33, %v412_v32  ;;  %1096 = vmatpush3.bf16.msra.mxu1 %v1227_v41 }
 0x1b7   : > { %1097 = vmatprep.subr.bf16.mxu1 %v1426_v19 }
 0x1b8   : > { %1076 = vmatmul.mubr.bf16.gmra.mrb[4].mxu0 %v415_v30  ;;  %1135 = vmatprep.subr.bf16.mxu0 %v416_v34 }
 0x1b9   : > { %1137 = vmatpush3.bf16.msra.mxu0 %v416_v34  ;;  %1079 = vmatprep.mubr.msk.bf16.mxu0 %vm1427_vm0, %v1426_v19 }
 0x1ba   : > { %1098 = vmatpush3.bf16.msra.mxu1 %v1228_v42 }
 0x1c0   : > { %1080 = vmatmul.mubr.bf16.gmra.mrb[8].mxu0 %v416_v34 }
 0x283   : > { %v519_v44 = vpop.f32.mrb[0].mxu0 }
 0x284   : > { %v520_v45 = vadd.f32 %v997_v43, %v519_v44  ;;  %v1073_v46 = vpop.f32.mrb[1].mxu0 }
 0x285   : > { %v522_v47 = vpop.f32.mrb[2].mxu0 }
 0x286   : > { %v542_v48 = vmul.f32 %v520_v45, %v520_v45  ;;  %v523_v49 = vadd.f32 %v997_v43, %v522_v47  ;;  %v1074_v50 = vpop.f32.mrb[3].mxu0 }
 0x288   : > { %v548_v51 = vmul.f32 %v542_v48, %v520_v45  ;;  %v543_v52 = vmul.f32 %v523_v49, %v523_v49 }
 0x28a   : > { %v554_v53 = vmul.f32 0.044715, %v548_v51  ;;  %v549_v54 = vmul.f32 %v543_v52, %v523_v49 }
 0x28b   : > { %v527_v55 = vpop.f32.mrb[4].mxu0 }
 0x28c   : > { %v560_v56 = vadd.f32 %v554_v53, %v520_v45  ;;  %v555_v57 = vmul.f32 0.044715, %v549_v54  ;;  %v528_v58 = vadd.f32 %v997_v43, %v527_v55  ;;  %v1077_v59 = vpop.f32.mrb[5].mxu0 }
 0x28d   : > { %v530_v60 = vpop.f32.mrb[6].mxu0 }
 0x28e   : > { %v566_v61 = vmul.f32 0.7978846, %v560_v56  ;;  %v561_v62 = vadd.f32 %v555_v57, %v523_v49  ;;  %v544_v63 = vmul.f32 %v528_v58, %v528_v58  ;;  %v531_v0 = vadd.f32 %v997_v43, %v530_v60  ;;  %v1078_v1 = vpop.f32.mrb[7].mxu0  ;;  %v1006_v56 = vld [vmem:[#allocation6 + $0x33] ss:$0 sm:$0xff] }
 0x290   : > { %1241 = vtanh.f32 %v566_v61  ;;  %v567_v2 = vmul.f32 0.7978846, %v561_v62  ;;  %v550_v3 = vmul.f32 %v544_v63, %v528_v58  ;;  %v545_v4 = vmul.f32 %v531_v0, %v531_v0 }
 0x292   : > { %1243 = vtanh.f32 %v567_v2  ;;  %v556_v5 = vmul.f32 0.044715, %v550_v3  ;;  %v551_v6 = vmul.f32 %v545_v4, %v531_v0 }
 0x293   : > { %v535_v7 = vpop.f32.mrb[8].mxu0 }
 0x294   : > { %v562_v8 = vadd.f32 %v556_v5, %v528_v58  ;;  %v557_v9 = vmul.f32 0.044715, %v551_v6  ;;  %v536_v10 = vadd.f32 %v997_v43, %v535_v7  ;;  %v1081_v11 = vpop.f32.mrb[9].mxu0 }
 0x295   : > { %v538_v12 = vpop.f32.mrb[10].mxu0 }
 0x296   : > { %v568_v13 = vmul.f32 0.7978846, %v562_v8  ;;  %v563_v14 = vadd.f32 %v557_v9, %v531_v0  ;;  %v546_v15 = vmul.f32 %v536_v10, %v536_v10  ;;  %v539_v16 = vadd.f32 %v997_v43, %v538_v12  ;;  %v1082_v17 = vpop.f32.mrb[11].mxu0 }
 0x298   : > { %1245 = vtanh.f32 %v568_v13  ;;  %v569_v18 = vmul.f32 0.7978846, %v563_v14  ;;  %v552_v20 = vmul.f32 %v546_v15, %v536_v10  ;;  %v547_v21 = vmul.f32 %v539_v16, %v539_v16 }
 0x29a   : > { %v1242_v22 = vpop.eup %1241  ;;  %1247 = vtanh.f32 %v569_v18  ;;  %v558_v23 = vmul.f32 0.044715, %v552_v20  ;;  %v553_v24 = vmul.f32 %v547_v21, %v539_v16 }
 0x29b   : > { %v578_v26 = vadd.f32 1.0, %v1242_v22 }
 0x29c   : > { %v1244_v27 = vpop.eup %1243  ;;  %v564_v28 = vadd.f32 %v558_v23, %v536_v10  ;;  %v559_v29 = vmul.f32 0.044715, %v553_v24 }
 0x29d   : > { %v579_v25 = vadd.f32 1.0, %v1244_v27  ;;  %v584_v30 = vmul.f32 0.5, %v578_v26 }
 0x29e   : > { %v570_v31 = vmul.f32 0.7978846, %v564_v28  ;;  %v565_v32 = vadd.f32 %v559_v29, %v539_v16 }
 0x29f   : > { %v585_v33 = vmul.f32 0.5, %v579_v25  ;;  %v590_v35 = vmul.f32 %v584_v30, %v520_v45 }
 0x2a0   : > { %1249 = vtanh.f32 %v570_v31  ;;  %v571_v34 = vmul.f32 0.7978846, %v565_v32 }
 0x2a1   : > { %v591_v36 = vmul.f32 %v585_v33, %v523_v49 }
 0x2a2   : > { %v1246_v37 = vpop.eup %1245  ;;  %1251 = vtanh.f32 %v571_v34 }
 0x2a3   : > { %v596_v38 = vpack.c.bf16 %v591_v36, %v590_v35  ;;  %v580_v39 = vadd.f32 1.0, %v1246_v37 }
 0x2a4   : > { %v1248_v40 = vpop.eup %1247 }
 0x2a5   : > { %1100 = vmatmul.mubr.bf16.vlgmr.msra.gmra.mrb[0].mxu1 %v596_v38  ;;  %v581_v41 = vadd.f32 1.0, %v1248_v40  ;;  %v586_v42 = vmul.f32 0.5, %v580_v39 }
 0x2a6   : > { %1103 = vmatprep.mubr.msk.bf16.mxu1 %vm1427_vm0, %v1426_v19 }
 0x2a7   : > { %v587_v43 = vmul.f32 0.5, %v581_v41  ;;  %v592_v44 = vmul.f32 %v586_v42, %v528_v58 }
 0x2a9   : > { %v593_v46 = vmul.f32 %v587_v43, %v531_v0 }
 0x2aa   : > { %v1250_v47 = vpop.eup %1249 }
 0x2ab   : > { %v597_v48 = vpack.c.bf16 %v593_v46, %v592_v44  ;;  %v582_v50 = vadd.f32 1.0, %v1250_v47 }
 0x2ac   : > { %v1252_v51 = vpop.eup %1251 }
 0x2ad   : > { %1104 = vmatmul.mubr.bf16.gmra.mrb[4].mxu1 %v597_v48  ;;  %v583_v45 = vadd.f32 1.0, %v1252_v51  ;;  %v588_v49 = vmul.f32 0.5, %v582_v50 }
 0x2ae   : > { %1107 = vmatprep.mubr.msk.bf16.mxu1 %vm1427_vm0, %v1426_v19 }
 0x2af   : > { %v589_v52 = vmul.f32 0.5, %v583_v45  ;;  %v594_v53 = vmul.f32 %v588_v49, %v536_v10 }
 0x2b1   : > { %v595_v54 = vmul.f32 %v589_v52, %v539_v16 }
 0x2b3   : > { %v598_v55 = vpack.c.bf16 %v595_v54, %v594_v53 }
 0x2b5   : > { %1108 = vmatmul.mubr.bf16.gmra.mrb[8].mxu1 %v598_v55 }
 0x378   : > { %v701_v57 = vpop.f32.mrb[0].mxu1 }
 0x379   : > { %v702_v59 = vadd.f32 %v1006_v56, %v701_v57  ;;  %v1101_v58 = vpop.f32.mrb[1].mxu1 }
 0x37a   : > { %v704_v60 = vpop.f32.mrb[2].mxu1 }
 0x37b   : > { %724 = vxpose.xlu0.b32.start [1/6] (short) (narrow) %v702_v59, 16  ;;  %v1102_v61 = vpop.f32.mrb[3].mxu1  ;;  %v705_v62 = vadd.f32 %v1006_v56, %v704_v60 }
 0x37f   : > { %725 = vxpose.xlu0.b32.cont [2/6] (short) (narrow) %v705_v62, 16 }
 0x380   : > { %v709_v63 = vpop.f32.mrb[4].mxu1 }
 0x381   : > { %v710_v0 = vadd.f32 %v1006_v56, %v709_v63  ;;  %v1105_v1 = vpop.f32.mrb[5].mxu1 }
 0x382   : > { %v712_v2 = vpop.f32.mrb[6].mxu1 }
 0x383   : > { %726 = vxpose.xlu0.b32.cont [3/6] (short) (narrow) %v710_v0, 16  ;;  %v1106_v19 = vpop.f32.mrb[7].mxu1  ;;  %v713_v3 = vadd.f32 %v1006_v56, %v712_v2 }
 0x387   : > { %727 = vxpose.xlu0.b32.cont [4/6] (short) (narrow) %v713_v3, 16 }
 0x388   : > { %v717_v4 = vpop.f32.mrb[8].mxu1 }
 0x389   : > { %v718_v5 = vadd.f32 %v1006_v56, %v717_v4  ;;  %v1109_v6 = vpop.f32.mrb[9].mxu1 }
 0x38a   : > { %v720_v7 = vpop.f32.mrb[10].mxu1 }
 0x38b   : > { %728 = vxpose.xlu0.b32.cont [5/6] (short) (narrow) %v718_v5, 16  ;;  %v1110_v8 = vpop.f32.mrb[11].mxu1  ;;  %v721_v9 = vadd.f32 %v1006_v56, %v720_v7 }
 0x38f   : > { %729 = vxpose.xlu0.b32.end [6/6] (short) (narrow) %v721_v9, 16 }
 0x3fb   : > { %v740_v10 = vpop.trf.xlu0 }
 0x3fc   : > { %v757_v11 = vsel %vm756_vm1, %v740_v10, -inf }
 0x3fd   : > { %758 = vmax.xlane.f32.xlu1 %v757_v11 }
 0x3ff   : > { %v741_v12 = vpop.trf.xlu0 }
 0x400   : > { %v760_v13 = vsel %vm756_vm1, %v741_v12, -inf }
 0x401   : > { %761 = vmax.xlane.f32.xlu1 %v760_v13 }
 0x48a   : > { %v759_v14 = vpop.xlane.xlu1 %758 }
 0x48b   : > { %v763_v15 = vsub.f32 %v740_v10, %v759_v14 }
 0x48d   : > { %v765_v16 = vmul.f32 1.442695, %v763_v15 }
 0x48e   : > { %v762_v17 = vpop.xlane.xlu1 %761 }
 0x48f   : > { %1253 = vpow2.f32 %v765_v16  ;;  %v764_v18 = vsub.f32 %v741_v12, %v762_v17 }
 0x491   : > { %v767_v20 = vmul.f32 1.442695, %v764_v18 }
 0x493   : > { %1255 = vpow2.f32 %v767_v20 }
 0x499   : > { %v1254_v21 = vpop.eup %1253 }
 0x49a   : > { %v769_v22 = vsel %vm756_vm1, %v1254_v21, 0.0 }
 0x49b   : > { %770 = vadd.xlane.f32.xlu1 %v769_v22 }
 0x49d   : > { %v1256_v23 = vpop.eup %1255 }
 0x49e   : > { %v772_v24 = vsel %vm756_vm1, %v1256_v23, 0.0 }
 0x49f   : > { %773 = vadd.xlane.f32.xlu1 %v772_v24 }
 0x528   : > { %v771_v26 = vpop.xlane.xlu1 %770 }
 0x529   : > { %1257 = vrcp.f32 %v771_v26 }
 0x52c   : > { %v774_v27 = vpop.xlane.xlu1 %773 }
 0x52d   : > { %1259 = vrcp.f32 %v774_v27 }
 0x533   : > { %v1258_v28 = vpop.eup %1257 }
 0x534   : > { %v777_v29 = vmul.f32 %v1258_v28, %v1254_v21 }
 0x536   : > { %1123 = vmatprep.mubr.msk.f32.mxu0 %vm756_vm1, %v777_v29 }
 0x537   : > { %v1260_v25 = vpop.eup %1259 }
 0x538   : > { %v778_v30 = vmul.f32 %v1260_v25, %v1256_v23 }
 0x53a   : > { %1124 = vmatmul.mubr.msk.f32.vlgmr.msra.gmra.mrb[12].mxu0 %vm756_vm1, %v778_v30 }
 0x60d   : > { %v1125_v31 = vpop.f32.mrb[12].mxu0 }
 0x60e   : > { %861 = vst [vmem:[%s286_s11 + $0x8] sm:$0xff] %v1125_v31  ;;  %v851_v32 = vpop.f32.mrb[13].mxu0 }
 0x60f   : > { %860 = vst [vmem:[%s286_s11] sm:$0xff] %v851_v32 }
 0x610   : > { %1360 = shalt.err (!%p1357_p13)
}
 0x611   : > { %s1361_s16 = scalar_lea.hbm %s1754_s10, 256  ;;  %s1365_s24 = scalar_lea.hbm %s1803_s5, 512 }
 0x612   : > { %p1362_p6 = scmp.ne.s32.totalorder %s1754_s10, %s1361_s16  ;;  %p1366_p7 = scmp.lt.u32.totalorder %s1754_s10, %s1803_s5 }
 0x613   : > { %p1367_p8 = scmp.lt.u32.totalorder %s1365_s24, %s1361_s16  ;;  %p1369_p0 = scmp.lt.u32.totalorder %s1361_s16, %s1754_s10 }
 0x614   : > { %p1363_p10 = pnand %p1362_p6, %p1817_p2 }
 0x615   : > { %p1368_p11 = por %p1367_p8, %p1366_p7 }
 0x616   : > { %p1364_p4 = pneg %p1363_p10 }
 0x617   : > { %p1370_p3 = por %p1369_p0, %p1368_p11 }
 0x619   : > { %p1371_p5 = pnand %p1370_p3, %p1364_p4 }
 0x61b   : > { %1374 = shalt.err (!%p1371_p5)
}
 0x61c   : > { %s1429_s12 = smov 128   ;;  %s1430_s30 = smov 8  }
 0x61d   : > { %1148 = dma.vmem_to_hbm [thread:$0]  (%p1817_p2), %s1749_s29, 256, %s1754_s10, %s863_s14, %s1429_s12, %s1429_s12, %s1430_s30  }
 0x61e PF: > { %s891_s9 = sand.u32 1, %s1405_s18   ;;  %p1818_p9 = scmp.ne.s32.totalorder %s1808_s25, 0 }
 0x61f   : > { %p1819_p12 = scmp.ge.s32.totalorder %s1417_s21, 2  ;;  %s892_s26 = scalar_lea.sflag [#allocation5], %s891_s9 }
 0x621   : > { %p1162_p1 = pnand %p1819_p12, %p1818_p9 }
 0x623   : > { %1400 = dma.done.wait (!%p1162_p1), %s892_s26, 256  }
 0x624   : > { %1402 = vsyncadd (!%p1162_p1), %s892_s26, 4294967040  ;;  %p19_p13 = scmp.ge.s32.totalorder %s1574_s23, 4   ;;  %s1820_s18 = smov %s1409_s19 }
 0x625   : > { %s1821_s19 = smov %s1413_s20  ;;  %s1822_s20 = smov %s1583_s7 }
 0x626   : > { %s1823_s21 = smov %s1574_s23  ;;  %21 = sbr.rel (!%p19_p13) target bundleno = 6 (0x6), region = 96 }
 0x62d   :  { %897 = vsyncpa [#allocation4], 1 }
 0x62e   :  { %899 = vsyncpa [#allocation4 + $0x1], 1 }
 0x62f   :  { %900 = vsyncpa [#allocation7], 1 }
 0x630   :  { %901 = vsyncpa [#allocation5], 1 }
 0x631   :  { %903 = vsyncpa [#allocation5 + $0x1], 1 }

</bundles_post_ra>
